<compile_context>
chip_gen: v7x
topology: tpu7x:2x2x1
jax: 0.10.0
libtpu: 0.0.40
codegen_flags: <defaults>
</compile_context>

<pallas_src>
import functools

import jax
import jax.numpy as jnp
from jax import lax
from jax.experimental import pallas as pl
from jax.experimental.pallas import tpu as pltpu


def _logreg_kernel_single(x_ref, w_ref, b_ref, o_ref):
    # nk == 1 fast path: whole feature axis in one block, no scratch.
    x = x_ref[...].astype(jnp.float32)
    w = w_ref[...].astype(jnp.float32)                 # (1, F), broadcast over rows
    z = jnp.sum(x * w, axis=-1, keepdims=True) + b_ref[0, 0]
    o_ref[...] = jax.nn.sigmoid(z).astype(o_ref.dtype)


def _logreg_kernel_multi(x_ref, w_ref, b_ref, o_ref, acc_ref, *, total_f, mask_tail):
    # x_ref: (tb, tk) VMEM (streamed)   w_ref: (1, Fp) VMEM (fully resident)
    # b_ref: (1, 1) SMEM   o_ref: (tb, 1)   acc_ref: (tb, 1) f32 scratch
    k = pl.program_id(1)
    nk = pl.num_programs(1)
    tk = x_ref.shape[1]

    @pl.when(k == 0)
    def _():
        acc_ref[...] = jnp.zeros_like(acc_ref)

    off = pl.multiple_of(k * tk, 128)
    x = x_ref[...].astype(jnp.float32)
    w = w_ref[:, pl.ds(off, tk)].astype(jnp.float32)   # (1, tk) slice of resident row
    is_last = k == nk - 1

    if mask_tail:
        # Only the ragged last feature block pays the VPU select.
        @pl.when(k != nk - 1)
        def _():
            acc_ref[...] += jnp.sum(x * w, axis=-1, keepdims=True)

        @pl.when(is_last)
        def _():
            lane = lax.broadcasted_iota(jnp.int32, x.shape, 1)
            xw = jnp.where((lane + off) < total_f, x * w, 0.0)
            acc_ref[...] += jnp.sum(xw, axis=-1, keepdims=True)
    else:
        acc_ref[...] += jnp.sum(x * w, axis=-1, keepdims=True)

    @pl.when(is_last)
    def _():
        z = acc_ref[...] + b_ref[0, 0]
        o_ref[...] = jax.nn.sigmoid(z).astype(o_ref.dtype)


def _round_up(x, m):
    return ((x + m - 1) // m) * m


_MAX_TK = 2048          # feature tile (lanes), multiple of 128
_MAX_TB = 4096          # batch tile cap (rows)


def _vmem_budgets():
    """Generation-aware VMEM budgets (v5e/v6e: 128 MiB; v7x: 64 MiB per TC)."""
    default_cap = 64 * 1024 * 1024           # conservative (v7x per-TC)
    try:
        info = pltpu.get_tpu_info()
        cap = int(getattr(info, "vmem_capacity_bytes", default_cap))
    except Exception:                         # defensive: fall back to v7x-safe
        cap = default_cap
    x_budget = (cap * 3) // 8                 # double-buffered x tile + f32 temps
    vmem_limit = (cap * 3) // 4
    two_tc = cap <= 96 * 1024 * 1024          # v7x heuristic (2 TCs/chip)
    return x_budget, vmem_limit, two_tc


def _choose_tb(B, tk, itemsize, x_budget, two_tc):
    # Per-row cost: double-buffered x tile + f32 cast/product temporaries, so
    # low-precision inputs can't blow the VMEM limit with f32 intermediates.
    per_row = 2 * tk * itemsize + 2 * tk * 4
    tb = max(8, (x_budget // per_row) // 8 * 8)
    tb = min(_MAX_TB, tb)
    if two_tc and B >= 16:
        # v7x: ensure nb >= 2 so both TensorCores get batch blocks.
        tb = min(tb, _round_up(pl.cdiv(B, 2), 8))
    if B <= tb:
        tb = B                                # single full-dim block (always legal)
    return tb


def logistic_regression(x, w, b, *, tb=None, tk=None):
    """x: (B, F); w: (1, F) (torch nn.Linear weight); b: (1,). Returns (B, 1)."""
    B, F = x.shape
    itemsize = jnp.dtype(x.dtype).itemsize
    x_budget, vmem_limit, two_tc = _vmem_budgets()

    # Feature tile.
    if tk is None:
        tk = F if F <= _MAX_TK else _MAX_TK
    if tk >= F:
        tk = F                                # nk == 1 fast path (full-dim block)
    else:
        assert tk % 128 == 0, "tk must be a multiple of 128 when tk < n_features"
    nk = pl.cdiv(F, tk)

    # Batch tile.
    if tb is None:
        tb = _choose_tb(B, tk, itemsize, x_budget, two_tc)
    if tb >= B:
        tb = B                                # full-dim block (always legal)
    else:
        assert tb % 8 == 0, "tb must be a multiple of 8 when tb < batch"
    nb = pl.cdiv(B, tb)

    # Weight stays f32 (no precision loss); pad only the tiny weight row so
    # in-kernel pl.ds slices never run out of bounds.  x is NOT padded.
    w_row = jnp.asarray(w, jnp.float32).reshape(1, F)
    Fp = nk * tk
    if Fp != F:
        w_row = jnp.pad(w_row, ((0, 0), (0, Fp - F)))
    b2 = jnp.asarray(b, jnp.float32).reshape(1, 1)

    cost = pl.CostEstimate(
        flops=2 * B * F + B,
        transcendentals=B,                    # one sigmoid per row
        bytes_accessed=B * F * itemsize + Fp * 4 + B * itemsize + 4,
    )
    compiler_params = pltpu.CompilerParams(
        dimension_semantics=("parallel",) if nk == 1 else ("parallel", "arbitrary"),
        vmem_limit_bytes=vmem_limit,
    )

    if nk == 1:
        grid_spec = pltpu.PrefetchScalarGridSpec(
            num_scalar_prefetch=0,
            grid=(nb,),
            in_specs=[
                pl.BlockSpec((tb, F), lambda i: (i, 0)),       # streamed x tile
                pl.BlockSpec((1, F), lambda i: (0, 0)),        # resident weight row
                pl.BlockSpec(memory_space=pltpu.SMEM),         # bias scalar
            ],
            out_specs=pl.BlockSpec((tb, 1), lambda i: (i, 0)),
        )
        kernel = _logreg_kernel_single
    else:
        grid_spec = pltpu.PrefetchScalarGridSpec(
            num_scalar_prefetch=0,
            grid=(nb, nk),
            in_specs=[
                pl.BlockSpec((tb, tk), lambda i, k: (i, k)),   # streamed x tile
                pl.BlockSpec((1, Fp), lambda i, k: (0, 0)),    # resident weight row
                pl.BlockSpec(memory_space=pltpu.SMEM),         # bias scalar
            ],
            out_specs=pl.BlockSpec((tb, 1), lambda i, k: (i, 0)),
            scratch_shapes=[pltpu.VMEM((tb, 1), jnp.float32)],
        )
        kernel = functools.partial(
            _logreg_kernel_multi, total_f=F, mask_tail=(F % tk != 0))

    return pl.pallas_call(
        kernel,
        out_shape=jax.ShapeDtypeStruct((B, 1), x.dtype),
        grid_spec=grid_spec,
        compiler_params=compiler_params,
        cost_estimate=cost,
    )(x, w_row, b2)


if __name__ == "__main__":
    key = jax.random.PRNGKey(0)
    ks = jax.random.split(key, 9)

    def make_case(kx, kw, kb, batch, n_features):
        x = jax.random.normal(kx, (batch, n_features), dtype=jnp.float32)
        bound = 1.0 / jnp.sqrt(jnp.float32(n_features))
        w = jax.random.uniform(kw, (1, n_features), minval=-bound, maxval=bound,
                               dtype=jnp.float32)
        b = jax.random.uniform(kb, (1,), minval=-bound, maxval=bound,
                               dtype=jnp.float32)
        return x, w, b

    def reference(x, w, b):
        return jax.nn.sigmoid(jnp.sum(x * w, axis=-1, keepdims=True) + b)

    # Case 1: small shapes from nn.Linear(n_features, 1); nk == 1 fast path.
    x1, w1, b1 = make_case(ks[0], ks[1], ks[2], 8, 32)
    out1 = jax.block_until_ready(logistic_regression(x1, w1, b1))
    assert out1.shape == (8, 1)
    assert jnp.allclose(out1, reference(x1, w1, b1), atol=1e-5, rtol=1e-5)

    # Case 2: explicit small tiles -> feature tiling (nk=3), ragged feature
    # tail masked in-kernel, partial trailing batch block, no x padding.
    x2, w2, b2 = make_case(ks[3], ks[4], ks[5], 20, 300)
    out2 = jax.block_until_ready(logistic_regression(x2, w2, b2, tb=8, tk=128))
    assert out2.shape == (20, 1)
    assert jnp.allclose(out2, reference(x2, w2, b2), atol=1e-5, rtol=1e-5)

    # Case 3: auto tiling with F > 2048 (nk=2, ragged tail) and auto tb.
    x3, w3, b3 = make_case(ks[6], ks[7], ks[8], 16, 2200)
    out3 = jax.block_until_ready(logistic_regression(x3, w3, b3))
    assert out3.shape == (16, 1)
    assert jnp.allclose(out3, reference(x3, w3, b3), atol=1e-5, rtol=1e-5)

    print("KERNEL_OK")
</pallas_src>

<mosaic_0001>
module attributes {stable_mosaic.version = 11 : i64} {
  func.func @_logreg_kernel_single(%arg0: i32, %arg1: memref<8x32xf32, #tpu.memory_space<vmem>>, %arg2: memref<1x32xf32, #tpu.memory_space<vmem>>, %arg3: memref<1x1xf32, #tpu.memory_space<smem>>, %arg4: memref<8x1xf32, #tpu.memory_space<vmem>>) attributes {dimension_semantics = [#tpu.dimension_semantics<parallel>], iteration_bounds = array<i64: 1>, scalar_prefetch = 0 : i64, scratch_operands = 0 : i64, tpu.core_type = #tpu.core_type<tc>, window_params = [{transform_indices = @transform_0, window_bounds = array<i64: 8, 32>}, {pipeline_mode = #tpu.pipeline_mode<synchronous>, transform_indices = @transform_1, window_bounds = array<i64: 1, 32>}, {transform_indices = @transform_2, window_bounds = array<i64: 1, 1>}, {transform_indices = @transform_3, window_bounds = array<i64: 8, 1>}]} {
    %c0 = arith.constant 0 : index
    %c0_0 = arith.constant 0 : index
    %0 = vector.load %arg1[%c0, %c0_0] : memref<8x32xf32, #tpu.memory_space<vmem>>, vector<8x32xf32>
    %c0_1 = arith.constant 0 : index
    %c0_2 = arith.constant 0 : index
    %1 = vector.load %arg2[%c0_1, %c0_2] : memref<1x32xf32, #tpu.memory_space<vmem>>, vector<1x32xf32>
    %2 = vector.broadcast %1 : vector<1x32xf32> to vector<8x32xf32>
    %3 = arith.mulf %0, %2 : vector<8x32xf32>
    %cst = arith.constant dense<0.000000e+00> : vector<8xf32>
    %4 = vector.multi_reduction <add>, %3, %cst [1] : vector<8x32xf32> to vector<8xf32>
    %5 = vector.shape_cast %4 : vector<8xf32> to vector<8x1xf32>
    %c0_3 = arith.constant 0 : index
    %c0_4 = arith.constant 0 : index
    %6 = memref.load %arg3[%c0_3, %c0_4] : memref<1x1xf32, #tpu.memory_space<smem>>
    %7 = vector.broadcast %6 : f32 to vector<8x1xf32>
    %8 = arith.addf %5, %7 : vector<8x1xf32>
    %9 = arith.negf %8 : vector<8x1xf32>
    %10 = math.exp %9 : vector<8x1xf32>
    %cst_5 = arith.constant 1.000000e+00 : f32
    %11 = vector.broadcast %cst_5 : f32 to vector<8x1xf32>
    %12 = arith.addf %11, %10 : vector<8x1xf32>
    %13 = arith.divf %11, %12 : vector<8x1xf32>
    %c0_6 = arith.constant 0 : index
    %c0_7 = arith.constant 0 : index
    %14 = vector.load %arg4[%c0_6, %c0_7] : memref<8x1xf32, #tpu.memory_space<vmem>>, vector<8x1xf32>
    tpu.vector_store %arg4[%c0_6, %c0_7], %13 {strides = array<i32>} : memref<8x1xf32, #tpu.memory_space<vmem>>, vector<8x1xf32>,
    return
  }
  func.func @transform_0(%arg0: i32) -> (i32, i32) {
    %c0_i32 = arith.constant 0 : i32
    %c0_i32_0 = arith.constant 0 : i32
    return %arg0, %c0_i32 : i32, i32
  }
  func.func @transform_1(%arg0: i32) -> (i32, i32) {
    %c0_i32 = arith.constant 0 : i32
    %c0_i32_0 = arith.constant 0 : i32
    %c0_i32_1 = arith.constant 0 : i32
    return %c0_i32, %c0_i32_0 : i32, i32
  }
  func.func @transform_2(%arg0: i32) -> (i32, i32) {
    %c0_i32 = arith.constant 0 : i32
    %c0_i32_0 = arith.constant 0 : i32
    %c0_i32_1 = arith.constant 0 : i32
    return %c0_i32, %c0_i32_0 : i32, i32
  }
  func.func @transform_3(%arg0: i32) -> (i32, i32) {
    %c0_i32 = arith.constant 0 : i32
    %c0_i32_0 = arith.constant 0 : i32
    return %arg0, %c0_i32 : i32, i32
  }
}

</mosaic_0001>

<bundles_post_ra>
// kernel: tpu_custom_call.1
= control target key start
LH: loop header
LB: loop body
LE: loop exit
PB: predicated region body
PF: predicated region fallthrough
CT: control target
= control target key end

     0   :  { %9 = vsyncpa [#allocation4], 0  ;;  %s87_s12 = smov [#allocation3]   ;;  %s129_s0 = inlined_call_operand.hbm [shape: f32[8,32], index: 0, kind: input, shape index: {}]   ;;  %s130_s1 = inlined_call_operand.vmem [shape: f32[1,32], index: 1, kind: input, shape index: {}]   ;;  %s131_s2 = inlined_call_operand.<no memory space> [shape: f32[1,1], index: 2, kind: input, shape index: {}]   ;;  %s132_s3 = inlined_call_operand.vmem [shape: f32[8,1], index: 3, kind: output, shape index: {}]  }
   0x1   :  { %s16_s13 = sshll.u32 %s87_s12, 4  ;;  %s63_s16 = scalar_lea.hbm %s129_s0, 128  ;;  %s17_s13 = int_to_ptr.vmem [resolvable:$true] %s16_s13 }
   0x2   :  { %p64_p0 = scmp.ne.s32.totalorder %s129_s0, %s63_s16  ;;  %p67_p1 = scmp.lt.u32.totalorder %s63_s16, %s129_s0 }
   0x4   :  { %p69_p2 = pnand %p67_p1, %p64_p0 }
   0x6   :  { %72 = shalt.err (!%p69_p2)
}
   0x7   :  { %s73_s21 = scalar_lea.vmem %s17_s13, 128  ;;  %p78_p4 = scmp.lt.s32.totalorder %s17_s13, %s17_s13 }
   0x8   :  { %p74_p3 = scmp.ne.s32.totalorder %s17_s13, %s73_s21  ;;  %p79_p5 = scmp.lt.s32.totalorder %s73_s21, %s73_s21 }
   0xa   :  { %p80_p6 = por %p79_p5, %p78_p4 }
   0xc   :  { %p81_p7 = pnand %p80_p6, %p74_p3 }
   0xe   :  { %84 = shalt.err (!%p81_p7)
}
   0xf   :  { %19 = dma.hbm_to_vmem [thread:$0]  %s129_s0, 128, %s17_s13, [#allocation4]  }
  0x10   :  { %85 = dma.done.wait [#allocation4], 128  }
  0x11   :  { %86 = vsyncadd [#allocation4], 4294967168  ;;  %v27_v0 = vld [vmem:[#allocation3] sm:$0xff]  ;;  %vm36_vm0 = vcmask 261120   ;;  %v41_v4 = vstv %s131_s2  ;;  %vm49_vm1 = vcmask 7168  }
  0x12   :  { %v56_v1 = vld [vmem:[%s130_s1] ss:$0 sm:$0xff] }
  0x13   :  { %v35_v2 = vmul.f32 %v56_v1, %v27_v0 }
  0x15   :  { %v37_v3 = vsel %vm36_vm0, %v35_v2, 0.0 }
  0x16   :  { %38 = vadd.xlane.f32.xlu0 %v37_v3 }
  0xa3   :  { %v39_v5 = vpop.xlane.xlu0 %38 }
  0xa4   :  { %v42_v6 = vadd.f32 %v41_v4, %v39_v5 }
  0xa6   :  { %v57_v7 = vmul.f32 -1.442695, %v42_v6 }
  0xa8   :  { %59 = vpow2.f32 %v57_v7 }
  0xb2   :  { %v60_v8 = vpop.eup %59 }
  0xb3   :  { %v46_v9 = vadd.f32 1.0, %v60_v8 }
  0xb5   :  { %61 = vrcp.f32 %v46_v9 }
  0xbf   :  { %v62_v10 = vpop.eup %61 }
  0xc0   :  { %50 = vst.msk [vmem:[%s132_s3] sm:$0xff] %vm49_vm1, %v62_v10 }
  0xc1   :  { %55 = vsyncpa [#allocation4], 1 }

</bundles_post_ra>
